<compile_context>
chip_gen: v7x
topology: tpu7x:2x2x1
jax: 0.10.0
libtpu: 0.0.40
codegen_flags: <defaults>
</compile_context>

<pallas_src>
import functools

import jax
import jax.numpy as jnp
from jax.experimental import pallas as pl
from jax.experimental.pallas import tpu as pltpu


def _tst_encoder_layer_kernel(
    src_ref,        # [1, q_len, d_model]
    wqkv_ref,       # [d_model, 3*d_model]
    bqkv_ref,       # [1, 3*d_model]
    wo_ref,         # [d_model, d_model]
    bo_ref,         # [1, d_model]
    bn1_scale_ref,  # [1, d_model]
    bn1_shift_ref,  # [1, d_model]
    w1_ref,         # [d_model, d_ff]
    b1_ref,         # [1, d_ff]
    w2_ref,         # [d_ff, d_model]
    b2_ref,         # [1, d_model]
    bn2_scale_ref,  # [1, d_model]
    bn2_shift_ref,  # [1, d_model]
    out_ref,        # [1, q_len, d_model]
    *, n_heads: int,
):
    x = src_ref[0].astype(jnp.float32)           # [q_len, d_model]
    d_model = x.shape[-1]
    d_k = d_model // n_heads
    scale = float(d_k) ** -0.5

    # ---- packed QKV projection (lane-dense 3*d_model output) ----
    qkv = jnp.dot(x, wqkv_ref[...], preferred_element_type=jnp.float32)
    qkv = qkv + bqkv_ref[...]
    q = qkv[:, 0 * d_model:1 * d_model]
    k = qkv[:, 1 * d_model:2 * d_model]
    v = qkv[:, 2 * d_model:3 * d_model]

    # ---- multi-head scaled dot-product attention (static loop over heads) ----
    head_outs = []
    for h in range(n_heads):
        lo, hi = h * d_k, (h + 1) * d_k
        qh = q[:, lo:hi]                          # [q_len, d_k]
        kh = k[:, lo:hi]
        vh = v[:, lo:hi]
        s = jax.lax.dot_general(                  # q @ k^T without explicit transpose
            qh, kh, (((1,), (1,)), ((), ())),
            preferred_element_type=jnp.float32) * scale
        s = s - jnp.max(s, axis=-1, keepdims=True)
        p = jnp.exp(s)
        p = p / jnp.sum(p, axis=-1, keepdims=True)
        head_outs.append(jnp.dot(p, vh, preferred_element_type=jnp.float32))
    attn = jnp.concatenate(head_outs, axis=-1)    # [q_len, d_model]

    # ---- output projection + residual + BatchNorm (folded to scale/shift) ----
    attn = jnp.dot(attn, wo_ref[...], preferred_element_type=jnp.float32) + bo_ref[...]
    x1 = x + attn
    x1 = x1 * bn1_scale_ref[...] + bn1_shift_ref[...]

    # ---- position-wise FFN + residual + BatchNorm ----
    hdn = jnp.dot(x1, w1_ref[...], preferred_element_type=jnp.float32) + b1_ref[...]
    hdn = jax.nn.gelu(hdn, approximate=True)      # tanh-GELU (see TODO above)
    ff = jnp.dot(hdn, w2_ref[...], preferred_element_type=jnp.float32) + b2_ref[...]
    x2 = x1 + ff
    x2 = x2 * bn2_scale_ref[...] + bn2_shift_ref[...]

    out_ref[0] = x2.astype(out_ref.dtype)


def tst_encoder_layer_forward(src, params, *, n_heads, bn_eps=1e-5):
    """
    src: [bs, q_len, d_model] float32
    params: dict of weights in math layout (w: [in, out], i.e. torch W.T), see __main__.
    returns: [bs, q_len, d_model]
    """
    bs, q_len, d_model = src.shape
    assert d_model % n_heads == 0, "d_model must be divisible by n_heads"
    d_ff = params["w1"].shape[1]

    # Eval-mode BatchNorm1d over the d_model channel folds to per-channel scale/shift.
    def fold_bn(gamma, beta, mean, var):
        s = gamma * jax.lax.rsqrt(var + bn_eps)
        return s.reshape(1, d_model), (beta - mean * s).reshape(1, d_model)

    bn1_scale, bn1_shift = fold_bn(params["bn1_gamma"], params["bn1_beta"],
                                   params["bn1_mean"], params["bn1_var"])
    bn2_scale, bn2_shift = fold_bn(params["bn2_gamma"], params["bn2_beta"],
                                   params["bn2_mean"], params["bn2_var"])

    # Pack Q/K/V projections into a single lane-dense matmul.
    w_qkv = jnp.concatenate([params["w_q"], params["w_k"], params["w_v"]], axis=1)
    b_qkv = jnp.concatenate(
        [params["b_q"], params["b_k"], params["b_v"]]).reshape(1, 3 * d_model)

    kernel = functools.partial(_tst_encoder_layer_kernel, n_heads=n_heads)

    return pl.pallas_call(
        kernel,
        out_shape=jax.ShapeDtypeStruct((bs, q_len, d_model), src.dtype),
        grid_spec=pltpu.PrefetchScalarGridSpec(
            num_scalar_prefetch=0,
            grid=(bs,),
            in_specs=[
                pl.BlockSpec((1, q_len, d_model), lambda b: (b, 0, 0)),     # src
                pl.BlockSpec((d_model, 3 * d_model), lambda b: (0, 0)),     # w_qkv
                pl.BlockSpec((1, 3 * d_model), lambda b: (0, 0)),           # b_qkv
                pl.BlockSpec((d_model, d_model), lambda b: (0, 0)),         # w_o
                pl.BlockSpec((1, d_model), lambda b: (0, 0)),               # b_o
                pl.BlockSpec((1, d_model), lambda b: (0, 0)),               # bn1_scale
                pl.BlockSpec((1, d_model), lambda b: (0, 0)),               # bn1_shift
                pl.BlockSpec((d_model, d_ff), lambda b: (0, 0)),            # w1
                pl.BlockSpec((1, d_ff), lambda b: (0, 0)),                  # b1
                pl.BlockSpec((d_ff, d_model), lambda b: (0, 0)),            # w2
                pl.BlockSpec((1, d_model), lambda b: (0, 0)),               # b2
                pl.BlockSpec((1, d_model), lambda b: (0, 0)),               # bn2_scale
                pl.BlockSpec((1, d_model), lambda b: (0, 0)),               # bn2_shift
            ],
            out_specs=pl.BlockSpec((1, q_len, d_model), lambda b: (b, 0, 0)),
        ),
        compiler_params=pltpu.CompilerParams(
            dimension_semantics=("parallel",)),   # megacore-shard the batch axis (v7x: 2 TCs)
    )(src, w_qkv, b_qkv,
      params["w_o"], params["b_o"].reshape(1, d_model),
      bn1_scale, bn1_shift,
      params["w1"], params["b1"].reshape(1, d_ff),
      params["w2"], params["b2"].reshape(1, d_model),
      bn2_scale, bn2_shift)


def ref_forward(src, params, *, n_heads, bn_eps=1e-5):
    """Pure-JAX reference of TSTEncoderLayer.forward (eval mode, post-norm BatchNorm)."""
    bs, q_len, d_model = src.shape
    d_k = d_model // n_heads

    def bn(x, g, b, m, v):
        return (x - m) / jnp.sqrt(v + bn_eps) * g + b

    q = src @ params["w_q"] + params["b_q"]
    k = src @ params["w_k"] + params["b_k"]
    v = src @ params["w_v"] + params["b_v"]
    q = q.reshape(bs, q_len, n_heads, d_k)
    k = k.reshape(bs, q_len, n_heads, d_k)
    v = v.reshape(bs, q_len, n_heads, d_k)
    s = jnp.einsum("bqhd,bkhd->bhqk", q, k) * (d_k ** -0.5)
    p = jax.nn.softmax(s, axis=-1)
    o = jnp.einsum("bhqk,bkhd->bqhd", p, v).reshape(bs, q_len, d_model)
    o = o @ params["w_o"] + params["b_o"]

    x = src + o
    x = bn(x, params["bn1_gamma"], params["bn1_beta"],
           params["bn1_mean"], params["bn1_var"])
    h = jax.nn.gelu(x @ params["w1"] + params["b1"], approximate=True)
    x = x + h @ params["w2"] + params["b2"]
    x = bn(x, params["bn2_gamma"], params["bn2_beta"],
           params["bn2_mean"], params["bn2_var"])
    return x


if __name__ == "__main__":
    # Small shapes consistent with the module: src [bs, q_len, d_model].
    bs, q_len, d_model, n_heads, d_ff = 2, 8, 32, 4, 64

    key = jax.random.PRNGKey(0)
    ks = jax.random.split(key, 22)

    def nrm(k, shape, s=0.1):
        return jax.random.normal(k, shape, dtype=jnp.float32) * s

    src = jax.random.normal(ks[21], (bs, q_len, d_model), dtype=jnp.float32)

    params = {
        # attention projections (w: [in, out] == torch weight.T)
        "w_q": nrm(ks[0], (d_model, d_model)), "b_q": nrm(ks[1], (d_model,)),
        "w_k": nrm(ks[2], (d_model, d_model)), "b_k": nrm(ks[3], (d_model,)),
        "w_v": nrm(ks[4], (d_model, d_model)), "b_v": nrm(ks[5], (d_model,)),
        "w_o": nrm(ks[6], (d_model, d_model)), "b_o": nrm(ks[7], (d_model,)),
        # feed-forward
        "w1": nrm(ks[8], (d_model, d_ff)), "b1": nrm(ks[9], (d_ff,)),
        "w2": nrm(ks[10], (d_ff, d_model)), "b2": nrm(ks[11], (d_model,)),
        # BatchNorm1d(d_model) running stats + affine (eval mode)
        "bn1_gamma": 1.0 + nrm(ks[12], (d_model,)),
        "bn1_beta": nrm(ks[13], (d_model,)),
        "bn1_mean": nrm(ks[14], (d_model,)),
        "bn1_var": jax.random.uniform(ks[15], (d_model,), jnp.float32, 0.5, 1.5),
        "bn2_gamma": 1.0 + nrm(ks[16], (d_model,)),
        "bn2_beta": nrm(ks[17], (d_model,)),
        "bn2_mean": nrm(ks[18], (d_model,)),
        "bn2_var": jax.random.uniform(ks[19], (d_model,), jnp.float32, 0.5, 1.5),
    }

    out = tst_encoder_layer_forward(src, params, n_heads=n_heads)
    out = jax.block_until_ready(out)

    ref = ref_forward(src, params, n_heads=n_heads)
    assert out.shape == (bs, q_len, d_model)
    # Loose tolerance accommodates MXU vs XLA f32 matmul pass differences.
    assert jnp.allclose(out, ref, atol=2e-2, rtol=2e-2), \
        float(jnp.max(jnp.abs(out - ref)))

    print("KERNEL_OK")
</pallas_src>

<mosaic_0001>
module attributes {stable_mosaic.version = 11 : i64} {
  func.func @_tst_encoder_layer_kernel(%arg0: i32, %arg1: memref<1x8x32xf32, #tpu.memory_space<vmem>>, %arg2: memref<32x96xf32, #tpu.memory_space<vmem>>, %arg3: memref<1x96xf32, #tpu.memory_space<vmem>>, %arg4: memref<32x32xf32, #tpu.memory_space<vmem>>, %arg5: memref<1x32xf32, #tpu.memory_space<vmem>>, %arg6: memref<1x32xf32, #tpu.memory_space<vmem>>, %arg7: memref<1x32xf32, #tpu.memory_space<vmem>>, %arg8: memref<32x64xf32, #tpu.memory_space<vmem>>, %arg9: memref<1x64xf32, #tpu.memory_space<vmem>>, %arg10: memref<64x32xf32, #tpu.memory_space<vmem>>, %arg11: memref<1x32xf32, #tpu.memory_space<vmem>>, %arg12: memref<1x32xf32, #tpu.memory_space<vmem>>, %arg13: memref<1x32xf32, #tpu.memory_space<vmem>>, %arg14: memref<1x8x32xf32, #tpu.memory_space<vmem>>) attributes {dimension_semantics = [#tpu.dimension_semantics<parallel>], iteration_bounds = array<i64: 2>, scalar_prefetch = 0 : i64, scratch_operands = 0 : i64, tpu.core_type = #tpu.core_type<tc>, window_params = [{transform_indices = @transform_0, window_bounds = array<i64: 1, 8, 32>}, {pipeline_mode = #tpu.pipeline_mode<synchronous>, transform_indices = @transform_1, window_bounds = array<i64: 32, 96>}, {pipeline_mode = #tpu.pipeline_mode<synchronous>, transform_indices = @transform_2, window_bounds = array<i64: 1, 96>}, {pipeline_mode = #tpu.pipeline_mode<synchronous>, transform_indices = @transform_3, window_bounds = array<i64: 32, 32>}, {pipeline_mode = #tpu.pipeline_mode<synchronous>, transform_indices = @transform_4, window_bounds = array<i64: 1, 32>}, {pipeline_mode = #tpu.pipeline_mode<synchronous>, transform_indices = @transform_5, window_bounds = array<i64: 1, 32>}, {pipeline_mode = #tpu.pipeline_mode<synchronous>, transform_indices = @transform_6, window_bounds = array<i64: 1, 32>}, {pipeline_mode = #tpu.pipeline_mode<synchronous>, transform_indices = @transform_7, window_bounds = array<i64: 32, 64>}, {pipeline_mode = #tpu.pipeline_mode<synchronous>, transform_indices = @transform_8, window_bounds = array<i64: 1, 64>}, {pipeline_mode = #tpu.pipeline_mode<synchronous>, transform_indices = @transform_9, window_bounds = array<i64: 64, 32>}, {pipeline_mode = #tpu.pipeline_mode<synchronous>, transform_indices = @transform_10, window_bounds = array<i64: 1, 32>}, {pipeline_mode = #tpu.pipeline_mode<synchronous>, transform_indices = @transform_11, window_bounds = array<i64: 1, 32>}, {pipeline_mode = #tpu.pipeline_mode<synchronous>, transform_indices = @transform_12, window_bounds = array<i64: 1, 32>}, {transform_indices = @transform_13, window_bounds = array<i64: 1, 8, 32>}]} {
    %c0 = arith.constant 0 : index
    %c0_0 = arith.constant 0 : index
    %c0_1 = arith.constant 0 : index
    %0 = vector.load %arg1[%c0, %c0_0, %c0_1] : memref<1x8x32xf32, #tpu.memory_space<vmem>>, vector<1x8x32xf32>
    %1 = vector.shape_cast %0 : vector<1x8x32xf32> to vector<8x32xf32>
    %c0_2 = arith.constant 0 : index
    %c0_3 = arith.constant 0 : index
    %2 = vector.load %arg2[%c0_2, %c0_3] : memref<32x96xf32, #tpu.memory_space<vmem>>, vector<32x96xf32>
    %cst = arith.constant dense<0.000000e+00> : vector<8x96xf32>
    %3 = tpu.matmul %1, %2, %cst {dimension_numbers = #tpu.dot_dimension_numbers<[1], [0], [0], [1], [0, 0, 1, 1], [], []>} : vector<8x32xf32>, vector<32x96xf32>, vector<8x96xf32> -> vector<8x96xf32>
    %c0_4 = arith.constant 0 : index
    %c0_5 = arith.constant 0 : index
    %4 = vector.load %arg3[%c0_4, %c0_5] : memref<1x96xf32, #tpu.memory_space<vmem>>, vector<1x96xf32>
    %5 = vector.broadcast %4 : vector<1x96xf32> to vector<8x96xf32>
    %6 = arith.addf %3, %5 : vector<8x96xf32>
    %7 = vector.extract_strided_slice %6 {offsets = [0, 0], sizes = [8, 32], strides = [1, 1]} : vector<8x96xf32> to vector<8x32xf32>
    %8 = vector.extract_strided_slice %6 {offsets = [0, 32], sizes = [8, 32], strides = [1, 1]} : vector<8x96xf32> to vector<8x32xf32>
    %9 = vector.extract_strided_slice %6 {offsets = [0, 64], sizes = [8, 32], strides = [1, 1]} : vector<8x96xf32> to vector<8x32xf32>
    %10 = vector.extract_strided_slice %7 {offsets = [0, 0], sizes = [8, 8], strides = [1, 1]} : vector<8x32xf32> to vector<8x8xf32>
    %11 = vector.extract_strided_slice %8 {offsets = [0, 0], sizes = [8, 8], strides = [1, 1]} : vector<8x32xf32> to vector<8x8xf32>
    %12 = vector.extract_strided_slice %9 {offsets = [0, 0], sizes = [8, 8], strides = [1, 1]} : vector<8x32xf32> to vector<8x8xf32>
    %cst_6 = arith.constant dense<0.000000e+00> : vector<8x8xf32>
    %13 = tpu.matmul %10, %11, %cst_6 {dimension_numbers = #tpu.dot_dimension_numbers<[1], [1], [0], [0], [0, 0, 1, 0], [], []>} : vector<8x8xf32>, vector<8x8xf32>, vector<8x8xf32> -> vector<8x8xf32>
    %cst_7 = arith.constant 0.353553385 : f32
    %14 = vector.broadcast %cst_7 : f32 to vector<8x8xf32>
    %15 = arith.mulf %13, %14 : vector<8x8xf32>
    %cst_8 = arith.constant dense<0xFF800000> : vector<8xf32>
    %16 = vector.multi_reduction <maximumf>, %15, %cst_8 [1] : vector<8x8xf32> to vector<8xf32>
    %17 = vector.shape_cast %16 : vector<8xf32> to vector<8x1xf32>
    %18 = vector.broadcast %17 : vector<8x1xf32> to vector<8x8xf32>
    %19 = arith.subf %15, %18 : vector<8x8xf32>
    %20 = math.exp %19 : vector<8x8xf32>
    %cst_9 = arith.constant dense<0.000000e+00> : vector<8xf32>
    %21 = vector.multi_reduction <add>, %20, %cst_9 [1] : vector<8x8xf32> to vector<8xf32>
    %22 = vector.shape_cast %21 : vector<8xf32> to vector<8x1xf32>
    %23 = vector.broadcast %22 : vector<8x1xf32> to vector<8x8xf32>
    %24 = arith.divf %20, %23 : vector<8x8xf32>
    %cst_10 = arith.constant dense<0.000000e+00> : vector<8x8xf32>
    %25 = tpu.matmul %24, %12, %cst_10 {dimension_numbers = #tpu.dot_dimension_numbers<[1], [0], [0], [1], [0, 0, 1, 1], [], []>} : vector<8x8xf32>, vector<8x8xf32>, vector<8x8xf32> -> vector<8x8xf32>
    %26 = vector.extract_strided_slice %7 {offsets = [0, 8], sizes = [8, 8], strides = [1, 1]} : vector<8x32xf32> to vector<8x8xf32>
    %27 = vector.extract_strided_slice %8 {offsets = [0, 8], sizes = [8, 8], strides = [1, 1]} : vector<8x32xf32> to vector<8x8xf32>
    %28 = vector.extract_strided_slice %9 {offsets = [0, 8], sizes = [8, 8], strides = [1, 1]} : vector<8x32xf32> to vector<8x8xf32>
    %cst_11 = arith.constant dense<0.000000e+00> : vector<8x8xf32>
    %29 = tpu.matmul %26, %27, %cst_11 {dimension_numbers = #tpu.dot_dimension_numbers<[1], [1], [0], [0], [0, 0, 1, 0], [], []>} : vector<8x8xf32>, vector<8x8xf32>, vector<8x8xf32> -> vector<8x8xf32>
    %cst_12 = arith.constant 0.353553385 : f32
    %30 = vector.broadcast %cst_12 : f32 to vector<8x8xf32>
    %31 = arith.mulf %29, %30 : vector<8x8xf32>
    %cst_13 = arith.constant dense<0xFF800000> : vector<8xf32>
    %32 = vector.multi_reduction <maximumf>, %31, %cst_13 [1] : vector<8x8xf32> to vector<8xf32>
    %33 = vector.shape_cast %32 : vector<8xf32> to vector<8x1xf32>
    %34 = vector.broadcast %33 : vector<8x1xf32> to vector<8x8xf32>
    %35 = arith.subf %31, %34 : vector<8x8xf32>
    %36 = math.exp %35 : vector<8x8xf32>
    %cst_14 = arith.constant dense<0.000000e+00> : vector<8xf32>
    %37 = vector.multi_reduction <add>, %36, %cst_14 [1] : vector<8x8xf32> to vector<8xf32>
    %38 = vector.shape_cast %37 : vector<8xf32> to vector<8x1xf32>
    %39 = vector.broadcast %38 : vector<8x1xf32> to vector<8x8xf32>
    %40 = arith.divf %36, %39 : vector<8x8xf32>
    %cst_15 = arith.constant dense<0.000000e+00> : vector<8x8xf32>
    %41 = tpu.matmul %40, %28, %cst_15 {dimension_numbers = #tpu.dot_dimension_numbers<[1], [0], [0], [1], [0, 0, 1, 1], [], []>} : vector<8x8xf32>, vector<8x8xf32>, vector<8x8xf32> -> vector<8x8xf32>
    %42 = vector.extract_strided_slice %7 {offsets = [0, 16], sizes = [8, 8], strides = [1, 1]} : vector<8x32xf32> to vector<8x8xf32>
    %43 = vector.extract_strided_slice %8 {offsets = [0, 16], sizes = [8, 8], strides = [1, 1]} : vector<8x32xf32> to vector<8x8xf32>
    %44 = vector.extract_strided_slice %9 {offsets = [0, 16], sizes = [8, 8], strides = [1, 1]} : vector<8x32xf32> to vector<8x8xf32>
    %cst_16 = arith.constant dense<0.000000e+00> : vector<8x8xf32>
    %45 = tpu.matmul %42, %43, %cst_16 {dimension_numbers = #tpu.dot_dimension_numbers<[1], [1], [0], [0], [0, 0, 1, 0], [], []>} : vector<8x8xf32>, vector<8x8xf32>, vector<8x8xf32> -> vector<8x8xf32>
    %cst_17 = arith.constant 0.353553385 : f32
    %46 = vector.broadcast %cst_17 : f32 to vector<8x8xf32>
    %47 = arith.mulf %45, %46 : vector<8x8xf32>
    %cst_18 = arith.constant dense<0xFF800000> : vector<8xf32>
    %48 = vector.multi_reduction <maximumf>, %47, %cst_18 [1] : vector<8x8xf32> to vector<8xf32>
    %49 = vector.shape_cast %48 : vector<8xf32> to vector<8x1xf32>
    %50 = vector.broadcast %49 : vector<8x1xf32> to vector<8x8xf32>
    %51 = arith.subf %47, %50 : vector<8x8xf32>
    %52 = math.exp %51 : vector<8x8xf32>
    %cst_19 = arith.constant dense<0.000000e+00> : vector<8xf32>
    %53 = vector.multi_reduction <add>, %52, %cst_19 [1] : vector<8x8xf32> to vector<8xf32>
    %54 = vector.shape_cast %53 : vector<8xf32> to vector<8x1xf32>
    %55 = vector.broadcast %54 : vector<8x1xf32> to vector<8x8xf32>
    %56 = arith.divf %52, %55 : vector<8x8xf32>
    %cst_20 = arith.constant dense<0.000000e+00> : vector<8x8xf32>
    %57 = tpu.matmul %56, %44, %cst_20 {dimension_numbers = #tpu.dot_dimension_numbers<[1], [0], [0], [1], [0, 0, 1, 1], [], []>} : vector<8x8xf32>, vector<8x8xf32>, vector<8x8xf32> -> vector<8x8xf32>
    %58 = vector.extract_strided_slice %7 {offsets = [0, 24], sizes = [8, 8], strides = [1, 1]} : vector<8x32xf32> to vector<8x8xf32>
    %59 = vector.extract_strided_slice %8 {offsets = [0, 24], sizes = [8, 8], strides = [1, 1]} : vector<8x32xf32> to vector<8x8xf32>
    %60 = vector.extract_strided_slice %9 {offsets = [0, 24], sizes = [8, 8], strides = [1, 1]} : vector<8x32xf32> to vector<8x8xf32>
    %cst_21 = arith.constant dense<0.000000e+00> : vector<8x8xf32>
    %61 = tpu.matmul %58, %59, %cst_21 {dimension_numbers = #tpu.dot_dimension_numbers<[1], [1], [0], [0], [0, 0, 1, 0], [], []>} : vector<8x8xf32>, vector<8x8xf32>, vector<8x8xf32> -> vector<8x8xf32>
    %cst_22 = arith.constant 0.353553385 : f32
    %62 = vector.broadcast %cst_22 : f32 to vector<8x8xf32>
    %63 = arith.mulf %61, %62 : vector<8x8xf32>
    %cst_23 = arith.constant dense<0xFF800000> : vector<8xf32>
    %64 = vector.multi_reduction <maximumf>, %63, %cst_23 [1] : vector<8x8xf32> to vector<8xf32>
    %65 = vector.shape_cast %64 : vector<8xf32> to vector<8x1xf32>
    %66 = vector.broadcast %65 : vector<8x1xf32> to vector<8x8xf32>
    %67 = arith.subf %63, %66 : vector<8x8xf32>
    %68 = math.exp %67 : vector<8x8xf32>
    %cst_24 = arith.constant dense<0.000000e+00> : vector<8xf32>
    %69 = vector.multi_reduction <add>, %68, %cst_24 [1] : vector<8x8xf32> to vector<8xf32>
    %70 = vector.shape_cast %69 : vector<8xf32> to vector<8x1xf32>
    %71 = vector.broadcast %70 : vector<8x1xf32> to vector<8x8xf32>
    %72 = arith.divf %68, %71 : vector<8x8xf32>
    %cst_25 = arith.constant dense<0.000000e+00> : vector<8x8xf32>
    %73 = tpu.matmul %72, %60, %cst_25 {dimension_numbers = #tpu.dot_dimension_numbers<[1], [0], [0], [1], [0, 0, 1, 1], [], []>} : vector<8x8xf32>, vector<8x8xf32>, vector<8x8xf32> -> vector<8x8xf32>
    %74 = tpu.concatenate %25, %41, %57, %73 in 1 : vector<8x8xf32>, vector<8x8xf32>, vector<8x8xf32>, vector<8x8xf32> -> vector<8x32xf32>
    %c0_26 = arith.constant 0 : index
    %c0_27 = arith.constant 0 : index
    %75 = vector.load %arg4[%c0_26, %c0_27] : memref<32x32xf32, #tpu.memory_space<vmem>>, vector<32x32xf32>
    %cst_28 = arith.constant dense<0.000000e+00> : vector<8x32xf32>
    %76 = tpu.matmul %74, %75, %cst_28 {dimension_numbers = #tpu.dot_dimension_numbers<[1], [0], [0], [1], [0, 0, 1, 1], [], []>} : vector<8x32xf32>, vector<32x32xf32>, vector<8x32xf32> -> vector<8x32xf32>
    %c0_29 = arith.constant 0 : index
    %c0_30 = arith.constant 0 : index
    %77 = vector.load %arg5[%c0_29, %c0_30] : memref<1x32xf32, #tpu.memory_space<vmem>>, vector<1x32xf32>
    %78 = vector.broadcast %77 : vector<1x32xf32> to vector<8x32xf32>
    %79 = arith.addf %76, %78 : vector<8x32xf32>
    %80 = arith.addf %1, %79 : vector<8x32xf32>
    %c0_31 = arith.constant 0 : index
    %c0_32 = arith.constant 0 : index
    %81 = vector.load %arg6[%c0_31, %c0_32] : memref<1x32xf32, #tpu.memory_space<vmem>>, vector<1x32xf32>
    %82 = vector.broadcast %81 : vector<1x32xf32> to vector<8x32xf32>
    %83 = arith.mulf %80, %82 : vector<8x32xf32>
    %c0_33 = arith.constant 0 : index
    %c0_34 = arith.constant 0 : index
    %84 = vector.load %arg7[%c0_33, %c0_34] : memref<1x32xf32, #tpu.memory_space<vmem>>, vector<1x32xf32>
    %85 = vector.broadcast %84 : vector<1x32xf32> to vector<8x32xf32>
    %86 = arith.addf %83, %85 : vector<8x32xf32>
    %c0_35 = arith.constant 0 : index
    %c0_36 = arith.constant 0 : index
    %87 = vector.load %arg8[%c0_35, %c0_36] : memref<32x64xf32, #tpu.memory_space<vmem>>, vector<32x64xf32>
    %cst_37 = arith.constant dense<0.000000e+00> : vector<8x64xf32>
    %88 = tpu.matmul %86, %87, %cst_37 {dimension_numbers = #tpu.dot_dimension_numbers<[1], [0], [0], [1], [0, 0, 1, 1], [], []>} : vector<8x32xf32>, vector<32x64xf32>, vector<8x64xf32> -> vector<8x64xf32>
    %c0_38 = arith.constant 0 : index
    %c0_39 = arith.constant 0 : index
    %89 = vector.load %arg9[%c0_38, %c0_39] : memref<1x64xf32, #tpu.memory_space<vmem>>, vector<1x64xf32>
    %90 = vector.broadcast %89 : vector<1x64xf32> to vector<8x64xf32>
    %91 = arith.addf %88, %90 : vector<8x64xf32>
    %92 = arith.mulf %91, %91 : vector<8x64xf32>
    %93 = arith.mulf %91, %92 : vector<8x64xf32>
    %cst_40 = arith.constant 4.471500e-02 : f32
    %94 = vector.broadcast %cst_40 : f32 to vector<8x64xf32>
    %95 = arith.mulf %94, %93 : vector<8x64xf32>
    %96 = arith.addf %91, %95 : vector<8x64xf32>
    %cst_41 = arith.constant 0.797884583 : f32
    %97 = vector.broadcast %cst_41 : f32 to vector<8x64xf32>
    %98 = arith.mulf %97, %96 : vector<8x64xf32>
    %99 = math.tanh %98 : vector<8x64xf32>
    %cst_42 = arith.constant 1.000000e+00 : f32
    %100 = vector.broadcast %cst_42 : f32 to vector<8x64xf32>
    %101 = arith.addf %100, %99 : vector<8x64xf32>
    %cst_43 = arith.constant 5.000000e-01 : f32
    %102 = vector.broadcast %cst_43 : f32 to vector<8x64xf32>
    %103 = arith.mulf %102, %101 : vector<8x64xf32>
    %104 = arith.mulf %91, %103 : vector<8x64xf32>
    %c0_44 = arith.constant 0 : index
    %c0_45 = arith.constant 0 : index
    %105 = vector.load %arg10[%c0_44, %c0_45] : memref<64x32xf32, #tpu.memory_space<vmem>>, vector<64x32xf32>
    %cst_46 = arith.constant dense<0.000000e+00> : vector<8x32xf32>
    %106 = tpu.matmul %104, %105, %cst_46 {dimension_numbers = #tpu.dot_dimension_numbers<[1], [0], [0], [1], [0, 0, 1, 1], [], []>} : vector<8x64xf32>, vector<64x32xf32>, vector<8x32xf32> -> vector<8x32xf32>
    %c0_47 = arith.constant 0 : index
    %c0_48 = arith.constant 0 : index
    %107 = vector.load %arg11[%c0_47, %c0_48] : memref<1x32xf32, #tpu.memory_space<vmem>>, vector<1x32xf32>
    %108 = vector.broadcast %107 : vector<1x32xf32> to vector<8x32xf32>
    %109 = arith.addf %106, %108 : vector<8x32xf32>
    %110 = arith.addf %86, %109 : vector<8x32xf32>
    %c0_49 = arith.constant 0 : index
    %c0_50 = arith.constant 0 : index
    %111 = vector.load %arg12[%c0_49, %c0_50] : memref<1x32xf32, #tpu.memory_space<vmem>>, vector<1x32xf32>
    %112 = vector.broadcast %111 : vector<1x32xf32> to vector<8x32xf32>
    %113 = arith.mulf %110, %112 : vector<8x32xf32>
    %c0_51 = arith.constant 0 : index
    %c0_52 = arith.constant 0 : index
    %114 = vector.load %arg13[%c0_51, %c0_52] : memref<1x32xf32, #tpu.memory_space<vmem>>, vector<1x32xf32>
    %115 = vector.broadcast %114 : vector<1x32xf32> to vector<8x32xf32>
    %116 = arith.addf %113, %115 : vector<8x32xf32>
    %c0_53 = arith.constant 0 : index
    %c0_54 = arith.constant 0 : index
    %c0_55 = arith.constant 0 : index
    %117 = vector.load %arg14[%c0_53, %c0_54, %c0_55] : memref<1x8x32xf32, #tpu.memory_space<vmem>>, vector<1x8x32xf32>
    %118 = vector.shape_cast %117 : vector<1x8x32xf32> to vector<8x32xf32>
    %119 = vector.shape_cast %116 : vector<8x32xf32> to vector<1x8x32xf32>
    tpu.vector_store %arg14[%c0_53, %c0_54, %c0_55], %119 {strides = array<i32>} : memref<1x8x32xf32, #tpu.memory_space<vmem>>, vector<1x8x32xf32>,
    return
  }
  func.func @transform_0(%arg0: i32) -> (i32, i32, i32) {
    %c0_i32 = arith.constant 0 : i32
    %c0_i32_0 = arith.constant 0 : i32
    %c0_i32_1 = arith.constant 0 : i32
    return %arg0, %c0_i32, %c0_i32_0 : i32, i32, i32
  }
  func.func @transform_1(%arg0: i32) -> (i32, i32) {
    %c0_i32 = arith.constant 0 : i32
    %c0_i32_0 = arith.constant 0 : i32
    %c0_i32_1 = arith.constant 0 : i32
    return %c0_i32, %c0_i32_0 : i32, i32
  }
  func.func @transform_2(%arg0: i32) -> (i32, i32) {
    %c0_i32 = arith.constant 0 : i32
    %c0_i32_0 = arith.constant 0 : i32
    %c0_i32_1 = arith.constant 0 : i32
    return %c0_i32, %c0_i32_0 : i32, i32
  }
  func.func @transform_3(%arg0: i32) -> (i32, i32) {
    %c0_i32 = arith.constant 0 : i32
    %c0_i32_0 = arith.constant 0 : i32
    %c0_i32_1 = arith.constant 0 : i32
    return %c0_i32, %c0_i32_0 : i32, i32
  }
  func.func @transform_4(%arg0: i32) -> (i32, i32) {
    %c0_i32 = arith.constant 0 : i32
    %c0_i32_0 = arith.constant 0 : i32
    %c0_i32_1 = arith.constant 0 : i32
    return %c0_i32, %c0_i32_0 : i32, i32
  }
  func.func @transform_5(%arg0: i32) -> (i32, i32) {
    %c0_i32 = arith.constant 0 : i32
    %c0_i32_0 = arith.constant 0 : i32
    %c0_i32_1 = arith.constant 0 : i32
    return %c0_i32, %c0_i32_0 : i32, i32
  }
  func.func @transform_6(%arg0: i32) -> (i32, i32) {
    %c0_i32 = arith.constant 0 : i32
    %c0_i32_0 = arith.constant 0 : i32
    %c0_i32_1 = arith.constant 0 : i32
    return %c0_i32, %c0_i32_0 : i32, i32
  }
  func.func @transform_7(%arg0: i32) -> (i32, i32) {
    %c0_i32 = arith.constant 0 : i32
    %c0_i32_0 = arith.constant 0 : i32
    %c0_i32_1 = arith.constant 0 : i32
    return %c0_i32, %c0_i32_0 : i32, i32
  }
  func.func @transform_8(%arg0: i32) -> (i32, i32) {
    %c0_i32 = arith.constant 0 : i32
    %c0_i32_0 = arith.constant 0 : i32
    %c0_i32_1 = arith.constant 0 : i32
    return %c0_i32, %c0_i32_0 : i32, i32
  }
  func.func @transform_9(%arg0: i32) -> (i32, i32) {
    %c0_i32 = arith.constant 0 : i32
    %c0_i32_0 = arith.constant 0 : i32
    %c0_i32_1 = arith.constant 0 : i32
    return %c0_i32, %c0_i32_0 : i32, i32
  }
  func.func @transform_10(%arg0: i32) -> (i32, i32) {
    %c0_i32 = arith.constant 0 : i32
    %c0_i32_0 = arith.constant 0 : i32
    %c0_i32_1 = arith.constant 0 : i32
    return %c0_i32, %c0_i32_0 : i32, i32
  }
  func.func @transform_11(%arg0: i32) -> (i32, i32) {
    %c0_i32 = arith.constant 0 : i32
    %c0_i32_0 = arith.constant 0 : i32
    %c0_i32_1 = arith.constant 0 : i32
    return %c0_i32, %c0_i32_0 : i32, i32
  }
  func.func @transform_12(%arg0: i32) -> (i32, i32) {
    %c0_i32 = arith.constant 0 : i32
    %c0_i32_0 = arith.constant 0 : i32
    %c0_i32_1 = arith.constant 0 : i32
    return %c0_i32, %c0_i32_0 : i32, i32
  }
  func.func @transform_13(%arg0: i32) -> (i32, i32, i32) {
    %c0_i32 = arith.constant 0 : i32
    %c0_i32_0 = arith.constant 0 : i32
    %c0_i32_1 = arith.constant 0 : i32
    return %arg0, %c0_i32, %c0_i32_0 : i32, i32, i32
  }
}

</mosaic_0001>

<bundles_post_ra>
// kernel: tpu_custom_call.1
= control target key start
LH: loop header
LB: loop body
LE: loop exit
PB: predicated region body
PF: predicated region fallthrough
CT: control target
= control target key end

     0   :  { %s2690_s0 = inlined_call_operand.hbm [shape: f32[2,8,32], index: 0, kind: input, shape index: {}]   ;;  %s2691_s1 = inlined_call_operand.vmem [shape: f32[32,96], index: 1, kind: input, shape index: {}]   ;;  %s2692_s2 = inlined_call_operand.vmem [shape: f32[1,96], index: 2, kind: input, shape index: {}]   ;;  %s2693_s3 = inlined_call_operand.vmem [shape: f32[32,32], index: 3, kind: input, shape index: {}]   ;;  %s2694_s4 = inlined_call_operand.vmem [shape: f32[1,32], index: 4, kind: input, shape index: {}]   ;;  %s2695_s5 = inlined_call_operand.hbm [shape: f32[1,32], index: 5, kind: input, shape index: {}]   ;;  %s2696_s6 = inlined_call_operand.hbm [shape: f32[1,32], index: 6, kind: input, shape index: {}]   ;;  %s2697_s7 = inlined_call_operand.vmem [shape: f32[32,64], index: 7, kind: input, shape index: {}]   ;;  %s2698_s8 = inlined_call_operand.hbm [shape: f32[1,64], index: 8, kind: input, shape index: {}]   ;;  %s2699_s9 = inlined_call_operand.vmem [shape: f32[64,32], index: 9, kind: input, shape index: {}]   ;;  %s2700_s10 = inlined_call_operand.vmem [shape: f32[1,32], index: 10, kind: input, shape index: {}]   ;;  %s2701_s11 = inlined_call_operand.vmem [shape: f32[1,32], index: 11, kind: input, shape index: {}]   ;;  %s2702_s12 = inlined_call_operand.vmem [shape: f32[1,32], index: 12, kind: input, shape index: {}]   ;;  %s2703_s13 = inlined_call_operand.hbm [shape: f32[2,8,32], index: 13, kind: output, shape index: {}]  }
   0x1   :  { %2710 = sst [smem:[#allocation17_spill]] %s2690_s0 }
   0x2   :  { %2711 = sst [smem:[#allocation18_spill]] %s2691_s1 }
   0x3   :  { %2712 = sst [smem:[#allocation19_spill]] %s2701_s11 }
   0x4   :  { %2713 = sst [smem:[#allocation20_spill]] %s2702_s12 }
   0x5   :  { %2714 = sst [smem:[#allocation21_spill]] %s2703_s13 }
   0x6   :  { %18 = vsyncpa [#allocation3], 0 }
   0x7   :  { %20 = vsyncpa [#allocation3 + $0x1], 0 }
   0x8   :  { %21 = vsyncpa [#allocation6], 0 }
   0x9   :  { %22 = vsyncpa [#allocation9], 0 }
   0xa   :  { %23 = vsyncpa [#allocation4], 0 }
   0xb   :  { %25 = vsyncpa [#allocation4 + $0x1], 0  ;;  %s2273_s25 = smov 0   ;;  %s2275_s26 = smov 0  }
   0xc   :  { %s2277_s27 = smov 0   ;;  %s2279_s28 = smov 0  }
   0xd LB: > { %2715 = sst [smem:[#allocation15_spill]] %s2167_s25  ;;  %s2294_s29 = sadd.s32 4294967295, %s2179_s28   ;;  %s2179_s28 = sphi %s2279_s28, %s2743_s28   ;;  %s2175_s27 = sphi %s2277_s27, %s2742_s27   ;;  %s2171_s26 = sphi %s2275_s26, %s2741_s26   ;;  %s2167_s25 = sphi %s2273_s25, %s2740_s25  }
   0xe   : > { %s1675_s30 = sadd.s32 4294967294, %s2179_s28   ;;  %p51_p0 = scmp.ne.s32.totalorder %s2171_s26, %s2167_s25 }
   0xf   : > { %p2707_p1 = scmp.eq.s32.totalorder %s2294_s29, 0  ;;  %p333_p3 = scmp.eq.s32.totalorder %s1675_s30, 1 }
  0x10   : > { %p1676_p5 = scmp.ge.s32.totalorder %s2179_s28, 1  ;;  %p340_p7 = scmp.lt.s32.totalorder %s2179_s28, 3 }
  0x11   : > { %p2303_p4 = por %p2707_p1, %p51_p0  ;;  %p2308_p6 = por %p333_p3, %p51_p0 }
  0x12   : > { %p2313_p8 = pnand %p1676_p5, %p340_p7  ;;  %s2181_s17 = smov [#allocation5]  }
  0x13   : > { %s2716_s14 = scalar_select %p2303_p4, 1, 0 }
  0x14   : > { %s2717_s15 = scalar_select %p2308_p6, 1, 0 }
  0x15   : > { %s2719_s16 = scalar_select %p2313_p8, 1, 0 }
  0x16   : > { %2718 = sst [smem:[#allocation16_spill]] %s2717_s15  ;;  %s365_s18 = sshll.u32 %s2181_s17, 4  ;;  %s366_s18 = int_to_ptr.vmem [resolvable:$true] %s365_s18 }
  0x17   : > { %p1895_p10 = pneg %p2313_p8  ;;  %s2182_s19 = smov [#allocation7]  }
  0x18   : > { %s376_s20 = sshll.u32 %s2182_s19, 4  ;;  %s2183_s22 = smov [#allocation8]   ;;  %s2326_s20 = int_to_ptr.vmem [resolvable:$true] %s376_s20 }
  0x19   : > { %p2322_p11 = pnand %p1895_p10, %p2707_p1  ;;  %s390_s23 = sshll.u32 %s2183_s22, 4  ;;  %s2328_s23 = int_to_ptr.vmem [resolvable:$true] %s390_s23 }
  0x1a   : > { %s1991_s17 = scalar_lea.hbm %s2695_s5, 16 }
  0x1b   : > { %p1992_p12 = scmp.ne.s32.totalorder %s2695_s5, %s1991_s17  ;;  %p2338_p13 = pneg %p2322_p11 }
  0x1c   : > { %p1998_p5 = scmp.lt.u32.totalorder %s1991_s17, %s2695_s5 }
  0x1d   : > { %p1994_p0 = pnand %p2338_p13, %p1992_p12 }
  0x1f   : > { %p1995_p3 = pneg %p1994_p0 }
  0x21   : > { %p2000_p7 = pnand %p1998_p5, %p1995_p3 }
  0x23   : > { %2003 = shalt.err (!%p2000_p7)
}
  0x24   : > { %s2004_s24 = scalar_lea.vmem %s366_s18, 16  ;;  %s2011_s25 = scalar_lea.vmem %s366_s18, 32 }
  0x25   : > { %p2005_p10 = scmp.ne.s32.totalorder %s366_s18, %s2004_s24  ;;  %p2012_p2 = scmp.lt.s32.totalorder %s366_s18, %s366_s18 }
  0x26   : > { %p2013_p6 = scmp.lt.s32.totalorder %s2011_s25, %s2004_s24 }
  0x27   : > { %p2007_p9 = pnand %p2005_p10, %p2338_p13 }
  0x28   : > { %p2014_p4 = por %p2013_p6, %p2012_p2 }
  0x29   : > { %p2008_p1 = pneg %p2007_p9 }
  0x2b   : > { %p2015_p8 = pnand %p2014_p4, %p2008_p1 }
  0x2d   : > { %2018 = shalt.err (!%p2015_p8)
}
  0x2e   : > { %1898 = dma.hbm_to_vmem [thread:$0]  (!%p2322_p11), %s2695_s5, 16, %s366_s18, [#allocation6]  }
  0x2f   : > { %s2019_s22 = scalar_lea.hbm %s2696_s6, 16 }
  0x30   : > { %p2020_p9 = scmp.ne.s32.totalorder %s2696_s6, %s2019_s22  ;;  %p2026_p1 = scmp.lt.u32.totalorder %s2019_s22, %s2696_s6 }
  0x32   : > { %p2022_p12 = pnand %p2020_p9, %p2338_p13 }
  0x34   : > { %p2023_p2 = pneg %p2022_p12 }
  0x36   : > { %p2028_p4 = pnand %p2026_p1, %p2023_p2 }
  0x38   : > { %2031 = shalt.err (!%p2028_p4)
}
  0x39   : > { %s2032_s18 = scalar_lea.vmem %s2326_s20, 16  ;;  %s2039_s11 = scalar_lea.vmem %s2326_s20, 32 }
  0x3a   : > { %p2033_p6 = scmp.ne.s32.totalorder %s2326_s20, %s2032_s18  ;;  %p2040_p3 = scmp.lt.s32.totalorder %s2326_s20, %s2326_s20 }
  0x3b   : > { %p2041_p5 = scmp.lt.s32.totalorder %s2039_s11, %s2032_s18 }
  0x3c   : > { %p2035_p8 = pnand %p2033_p6, %p2338_p13 }
  0x3d   : > { %p2042_p7 = por %p2041_p5, %p2040_p3 }
  0x3e   : > { %p2036_p0 = pneg %p2035_p8 }
  0x40   : > { %p2043_p10 = pnand %p2042_p7, %p2036_p0 }
  0x42   : > { %2046 = shalt.err (!%p2043_p10)
}
  0x43   : > { %1901 = dma.hbm_to_vmem [thread:$0]  (!%p2322_p11), %s2696_s6, 16, %s2326_s20, [#allocation6]  }
  0x44   : > { %s2047_s17 = scalar_lea.hbm %s2698_s8, 16 }
  0x45   : > { %p2048_p9 = scmp.ne.s32.totalorder %s2698_s8, %s2047_s17  ;;  %p2054_p1 = scmp.lt.u32.totalorder %s2047_s17, %s2698_s8 }
  0x47   : > { %p2050_p12 = pnand %p2048_p9, %p2338_p13 }
  0x49   : > { %p2051_p2 = pneg %p2050_p12 }
  0x4b   : > { %p2056_p4 = pnand %p2054_p1, %p2051_p2 }
  0x4d   : > { %2059 = shalt.err (!%p2056_p4)
}
  0x4e   : > { %s2060_s20 = scalar_lea.vmem %s2328_s23, 16  ;;  %s2067_s11 = scalar_lea.vmem %s2328_s23, 32 }
  0x4f   : > { %p2061_p6 = scmp.ne.s32.totalorder %s2328_s23, %s2060_s20  ;;  %p2068_p3 = scmp.lt.s32.totalorder %s2328_s23, %s2328_s23 }
  0x50   : > { %p2069_p5 = scmp.lt.s32.totalorder %s2067_s11, %s2060_s20 }
  0x51   : > { %p2063_p8 = pnand %p2061_p6, %p2338_p13 }
  0x52   : > { %p2070_p7 = por %p2069_p5, %p2068_p3 }
  0x53   : > { %p2064_p0 = pneg %p2063_p8 }
  0x55   : > { %p2071_p10 = pnand %p2070_p7, %p2064_p0 }
  0x57   : > { %2074 = shalt.err (!%p2071_p10)
}
  0x58   : > { %1904 = dma.hbm_to_vmem [thread:$0]  (!%p2322_p11), %s2698_s8, 16, %s2328_s23, [#allocation9]  }
  0x59   : > { %s2403_s19 = sadd.s32 1, %s2179_s28   ;;  %s38_s30 = sadd.s32 1, %s2175_s27 }
  0x5a   : > { %s35_s21 = ssub.s32 %s2179_s28, %s2403_s19  ;;  %p45_p9 = scmp.ne.s32.totalorder %s2175_s27, %s2171_s26 }
  0x5b   : > { %p36_p13 = scmp.eq.s32.totalorder %s35_s21, 0  ;;  %p46_p12 = scmp.eq.s32.totalorder %s2179_s28, 0 }
  0x5c   : > { %p1916_p2 = scmp.lt.s32.totalorder %s2179_s28, 2  ;;  %p2722_p4 = scmp.eq.s32.totalorder %s2294_s29, 1 }
  0x5d   : > { %s2413_s13 = scalar_select %p36_p13, %s2175_s27, %s38_s30  }
  0x5e   : > { %p47_p1 = por %p46_p12, %p45_p9  ;;  %p2417_p6 = por %p2722_p4, %p45_p9 }
  0x5f   : > { %s413_s22 = sand.u32 1, %s2175_s27   ;;  %s1682_s24 = sshll.u32 %s2179_s28, 7 }
  0x60   : > { %s1681_s23 = sshll.u32 %s413_s22, 3  ;;  %s2724_s0 = sld [smem:[#allocation17_spill]] }
  0x61   : > { %s417_s11 = scalar_lea.vmem [#allocation2], %s1681_s23  ;;  %p2428_p11 = pnand %p1916_p2, %p47_p1 }
  0x62   : > { %s424_s12 = sshll.u32 %s417_s11, 4  ;;  %s414_s21 = scalar_lea.sflag [#allocation3], %s413_s22  ;;  %s2432_s12 = int_to_ptr.vmem [resolvable:$true] %s424_s12 }
  0x63   : > { %p2077_p0 = pneg %p2428_p11 }
  0x66   : > { %s2426_s20 = scalar_lea.hbm %s2724_s0, %s1682_s24  ;;  %s2080_s25 = scalar_lea.hbm %s2724_s0, 256 }
  0x67   : > { %s2075_s30 = scalar_lea.hbm %s2426_s20, 128  ;;  %p2081_p7 = scmp.lt.u32.totalorder %s2426_s20, %s2724_s0 }
  0x68   : > { %p2076_p8 = scmp.ne.s32.totalorder %s2426_s20, %s2075_s30  ;;  %p2082_p10 = scmp.lt.u32.totalorder %s2080_s25, %s2075_s30 }
  0x69   : > { %p2084_p9 = scmp.lt.u32.totalorder %s2075_s30, %s2426_s20 }
  0x6a   : > { %p2078_p3 = pnand %p2077_p0, %p2076_p8  ;;  %p2083_p13 = por %p2082_p10, %p2081_p7 }
  0x6c   : > { %p2079_p5 = pneg %p2078_p3  ;;  %p2085_p12 = por %p2084_p9, %p2083_p13 }
  0x6e   : > { %p2086_p2 = pnand %p2085_p12, %p2079_p5 }
  0x70   : > { %2089 = shalt.err (!%p2086_p2)
}
  0x71   : > { %s2090_s22 = scalar_lea.vmem %s2432_s12, 128  ;;  %s2184_s24 = smov [#allocation2]  }
  0x72   : > { %p2091_p1 = scmp.ne.s32.totalorder %s2432_s12, %s2090_s22  ;;  %s2095_s23 = sshll.u32 %s2184_s24, 4  ;;  %s2096_s23 = int_to_ptr.vmem [resolvable:$false] %s2095_s23 }
  0x73   : > { %s2097_s18 = scalar_lea.vmem %s2096_s23, 256  ;;  %p2098_p3 = scmp.lt.s32.totalorder %s2432_s12, %s2096_s23 }
  0x74   : > { %p2093_p4 = pnand %p2091_p1, %p2077_p0  ;;  %p2099_p7 = scmp.lt.s32.totalorder %s2097_s18, %s2090_s22 }
  0x76   : > { %p2094_p8 = pneg %p2093_p4  ;;  %p2100_p10 = por %p2099_p7, %p2098_p3 }
  0x78   : > { %p2101_p13 = pnand %p2100_p10, %p2094_p8 }
  0x7a   : > { %2104 = shalt.err (!%p2101_p13)
}
  0x7b   : > { %1908 = dma.hbm_to_vmem [thread:$0]  (!%p2428_p11), %s2426_s20, 128, %s2432_s12, %s414_s21  }
  0x7c   : > { %p2726_p5 = scmp.ne.s32.totalorder %s2719_s16, 0 }
  0x7d   : > { %s2462_s30 = sand.u32 (!%p2726_p5), 1, %s2171_s26   ;;  %p2727_p0 = scmp.ne.s32.totalorder (!%p2726_p5), %s2716_s14, 0 }
  0x7e   : > { %433 = sbr.rel (%p2726_p5) target bundleno = 2097 (0x831), region = 72  ;;  %s1684_s25 = sshll.u32 (!%p2726_p5), %s2462_s30, 3 }
  0x7f   : > { %s436_s11 = scalar_lea.sflag (!%p2726_p5), [#allocation3], %s2462_s30  ;;  %s439_s22 = scalar_lea.vmem (!%p2726_p5), [#allocation2], %s1684_s25 }
  0x85   : > { %2150 = dma.done.wait (%p2727_p0), %s436_s11, 128  }
  0x86   : > { %2152 = vsyncadd (%p2727_p0), %s436_s11, 4294967168  ;;  %p2728_p11 = scmp.eq.s32.totalorder %s2294_s29, 0 }
  0x88   : > { %2154 = dma.done.wait (%p2728_p11), [#allocation6], 32   ;;  %p2729_p9 = pmov %p2728_p11 }
  0x8a   : > { %2156 = vsyncadd (%p2729_p9), [#allocation6], 4294967264  ;;  %p2730_p12 = pmov %p2729_p9 }
  0x8b   : > { %p2731_p2 = pmov %p2729_p9 }
  0x8c   : > { %2158 = dma.done.wait (%p2730_p12), [#allocation9], 16  }
  0x8d   : > { %2160 = vsyncadd (%p2731_p2), [#allocation9], 4294967280  ;;  %v2185_v0 = vmov 0.0|0.0   ;;  %vm2186_vm0 = vmmov 0   ;;  %v2187_v1 = vmov 0.0   ;;  %s2732_s1 = sld [smem:[#allocation18_spill]] }
  0x8e   : > { %1849 = vmatprep.subr.bf16.mxu1 %v2185_v0  ;;  %1765 = vmatprep.mubr.msk.f32.mxu1 %vm2186_vm0, %v2187_v1  ;;  %v2499_v8 = vld [vmem:[%s439_s22] sm:$0xff]  ;;  %vm506_vm1 = vcmask 261120   ;;  %s2188_s14 = smov 120   ;;  %s2189_s22 = smov 96   ;;  %vm583_vm2 = vcmask 64512   ;;  %vm1257_vm3 = vcmask 130048  }
  0x8f   : > { %1778 = vmatprep.subr.mxu0 %v2187_v1  ;;  %1780 = vmatprep.mubr.msk.f32.mxu0 %vm2186_vm0, %v2187_v1  ;;  %v1689_v9 = vld [vmem:[%s2692_s2] ss:$0 sm:$0xff]  ;;  %s2190_s16 = smov 80   ;;  %s2191_s20 = smov 88   ;;  %vm1259_vm4 = vcmask 195584   ;;  %vm1470_vm5 = vcmask 523264  }
  0x90   : > { %s2192_s12 = smov 72   ;;  %s2193_s15 = smov 112  }
  0x91   : > { %s2194_s21 = smov 104   ;;  %s2195_s24 = smov 56  }
  0x92   : > { %s2196_s23 = smov 64   ;;  %s2197_s18 = smov 48  }
  0x93   : > { %v495_v2 = vld [vmem:[%s2732_s1] sm:$0xff]  ;;  %v496_v3 = vld [vmem:[%s2732_s1 + $0x8] sm:$0xff]  ;;  %v497_v4 = vld [vmem:[%s2732_s1 + $0x10] sm:$0xff]  ;;  %s2198_s11 = smov 40   ;;  %s2735_s0 = sld [smem:[#allocation21_spill]] }
  0x94   : > { %v1850_v5 = vpack.c.bf16 %v496_v3, %v495_v2  ;;  %v498_v6 = vld [vmem:[%s2732_s1 + $0x18] sm:$0xff] }
  0x95   : > { %v1853_v7 = vpack.c.bf16 %v498_v6, %v497_v4 }
  0x96   : > { %1851 = vmatpush3.bf16.msra.mxu1 %v1850_v5 }
  0x97   : > { %1852 = vmatprep.subr.bf16.mxu1 %v2185_v0 }
  0x9a   : > { %1854 = vmatpush3.bf16.msra.mxu1 %v1853_v7 }
  0x9b   : > { %1768 = vmatprep.subr.mxu1 %v2187_v1 }
  0x9d   : > { %1766 = vmatmul.mubr.msk.f32.vlgmr.msra.gmra.mrb[0].mxu1 %vm506_vm1, %v2499_v8 }
  0x9e   : > { %1770 = vmatprep.mubr.msk.f32.mxu1 %vm2186_vm0, %v2187_v1 }
 0x170   : > { %v576_v10 = vpop.f32.mrb[0].mxu1 }
 0x171   : > { %v2509_v11 = vadd.f32 %v1689_v9, %v576_v10  ;;  %v1767_v12 = vpop.f32.mrb[1].mxu1 }
 0x172   : > { %v1262_v12 = vld [vmem:[%s2693_s3 + $0x8] sm:$0xff] }
 0x173   : > { %746 = vrot.lane.b32.xlu1 %v2509_v11, %s2188_s14  ;;  %581 = vrot.lane.b32.xlu0 %v2509_v11, %s2189_s22  ;;  %s2734_s14 = sld [smem:[#allocation20_spill]]  ;;  %s1714_s22 = sshll.u32 %s2294_s29, 7 }
 0x174   : > { %s2645_s1 = scalar_lea.hbm %s2735_s0, %s1714_s22  ;;  %s2202_s29 = smov [#allocation10]  }
 0x177   : > { %914 = vrot.lane.b32.xlu1 %v2509_v11, %s2190_s16  ;;  %748 = vrot.lane.b32.xlu0 %v2509_v11, %s2191_s20  ;;  %s493_s16 = scalar_lea.vmem [#allocation10], %s1684_s25  ;;  %s2109_s25 = sshll.u32 %s2202_s29, 4  ;;  %s2110_s25 = int_to_ptr.vmem [resolvable:$false] %s2109_s25 }
 0x178   : > { %s1576_s20 = sshll.u32 %s493_s16, 4  ;;  %s2647_s20 = int_to_ptr.vmem [resolvable:$true] %s1576_s20 }
 0x179   : > { %p2112_p3 = scmp.lt.s32.totalorder %s2647_s20, %s2110_s25 }
 0x17b   : > { %1080 = vrot.lane.b32.xlu1 %v2509_v11, %s2192_s12  ;;  %912 = vrot.lane.b32.xlu0 %v2509_v11, %s2193_s15  ;;  %s2199_s12 = smov 8  }
 0x17f   : > { %1078 = vrot.lane.b32.xlu0 %v2509_v11, %s2194_s21  ;;  %s1563_s21 = scalar_lea.sflag [#allocation4], %s2462_s30 }
 0x1e5   : > { %v747_v13 = vpop.permute.xlu1 %746  ;;  %v582_v14 = vpop.permute.xlu0 %581 }
 0x1e6   : > { %1769 = vmatpush3.xpose.msk.msra.mxu1 %vm583_vm2, %v582_v14 }
 0x1e7   : > { %1773 = vmatprep.subr.mxu1 %v2187_v1 }
 0x1e9   : > { %1771 = vmatmul.mubr.msk.f32.vlgmr.msra.gmra.mrb[2].mxu1 %vm583_vm2, %v2509_v11  ;;  %v749_v15 = vpop.permute.xlu0 %748  ;;  %v915_v16 = vpop.permute.xlu1 %914 }
 0x1ea   : > { %1779 = vmatpush3.xpose.msk.msra.mxu0 %vm583_vm2, %v749_v15  ;;  %1775 = vmatprep.mubr.msk.f32.mxu1 %vm2186_vm0, %v2187_v1 }
 0x1eb   : > { %1788 = vmatprep.subr.mxu0 %v2187_v1 }
 0x1ed   : > { %1781 = vmatmul.mubr.msk.f32.vlgmr.msra.gmra.mrb[0].mxu0 %vm583_vm2, %v747_v13  ;;  %v913_v17 = vpop.permute.xlu0 %912  ;;  %v1081_v18 = vpop.permute.xlu1 %1080 }
 0x1ee   : > { %1789 = vmatpush3.xpose.msk.msra.mxu0 %vm583_vm2, %v915_v16  ;;  %1790 = vmatprep.mubr.msk.f32.mxu0 %vm2186_vm0, %v2187_v1 }
 0x1ef   : > { %1798 = vmatprep.subr.mxu0 %v2187_v1 }
 0x1f1   : > { %1791 = vmatmul.mubr.msk.f32.vlgmr.msra.gmra.mrb[2].mxu0 %vm583_vm2, %v913_v17  ;;  %v1079_v19 = vpop.permute.xlu0 %1078 }
 0x1f2   : > { %1799 = vmatpush3.xpose.msk.msra.mxu0 %vm583_vm2, %v1081_v18  ;;  %1800 = vmatprep.mubr.msk.f32.mxu0 %vm2186_vm0, %v2187_v1  ;;  %v1263_v18 = vld [vmem:[%s2693_s3 + $0x10] sm:$0xff] }
 0x1f3   : > { %1855 = vmatprep.subr.bf16.mxu0 %v2185_v0 }
 0x1f5   : > { %1801 = vmatmul.mubr.msk.f32.vlgmr.msra.gmra.mrb[4].mxu0 %vm583_vm2, %v1079_v19  ;;  %v1264_v19 = vld [vmem:[%s2693_s3 + $0x18] sm:$0xff] }
 0x1f6   : > { %1816 = vmatprep.mubr.msk.f32.mxu0 %vm2186_vm0, %v2187_v1 }
 0x2bc   : > { %v654_v20 = vpop.f32.mrb[2].mxu1 }
 0x2bd   : > { %v658_v21 = vmul.f32 0.35355338, %v654_v20  ;;  %v1772_v22 = vpop.f32.mrb[3].mxu1  ;;  %v1859_v20 = vpack.c.bf16 %v1264_v19, %v1263_v18 }
 0x2bf   : > { %v659_v23 = vsel %vm583_vm2, %v658_v21, -inf }
 0x2c0   : > { %v820_v24 = vpop.f32.mrb[0].mxu0  ;;  %660 = vmax.xlane.f32.xlu1 %v659_v23 }
 0x2c1   : > { %v824_v25 = vmul.f32 0.35355338, %v820_v24  ;;  %v1782_v26 = vpop.f32.mrb[1].mxu0 }
 0x2c3   : > { %v825_v27 = vsel %vm583_vm2, %v824_v25, -inf }
 0x2c4   : > { %826 = vmax.xlane.f32.xlu0 %v825_v27  ;;  %v986_v28 = vpop.f32.mrb[2].mxu0 }
 0x2c5   : > { %v990_v29 = vmul.f32 0.35355338, %v986_v28  ;;  %v1792_v30 = vpop.f32.mrb[3].mxu0 }
 0x2c7   : > { %v991_v31 = vsel %vm583_vm2, %v990_v29, -inf }
 0x2c8   : > { %992 = vmax.xlane.f32.xlu0 %v991_v31  ;;  %v1152_v32 = vpop.f32.mrb[4].mxu0  ;;  %v1362_v31 = vld [vmem:[%s2697_s7] sm:$0xff] }
 0x2c9   : > { %v1156_v33 = vmul.f32 0.35355338, %v1152_v32  ;;  %v1802_v34 = vpop.f32.mrb[5].mxu0  ;;  %v1363_v32 = vld [vmem:[%s2697_s7 + $0x8] sm:$0xff] }
 0x2ca   : > { %v1364_v34 = vld [vmem:[%s2697_s7 + $0x10] sm:$0xff] }
 0x2cb   : > { %v1157_v35 = vsel %vm583_vm2, %v1156_v33, -inf }
 0x2cc   : > { %1158 = vmax.xlane.f32.xlu1 %v1157_v35 }
 0x2dd   : > { %836 = vrot.lane.b32.xlu1 %v2509_v11, %s2195_s24  ;;  %s2105_s24 = scalar_lea.vmem %s2647_s20, 128 }
 0x2de   : > { %p2106_p1 = scmp.ne.s32.totalorder %s2647_s20, %s2105_s24 }
 0x2e0   : > { %p2107_p4 = pnand %p2106_p1, %p2417_p6 }
 0x2e2   : > { %p2108_p8 = pneg %p2107_p4 }
 0x34d   : > { %v661_v36 = vpop.xlane.xlu1 %660 }
 0x34e   : > { %v662_v37 = vsub.f32 %v658_v21, %v661_v36  ;;  %v1703_v36 = vld [vmem:[%s2694_s4] ss:$0 sm:$0xff] }
 0x350   : > { %v663_v38 = vmul.f32 1.442695, %v662_v37 }
 0x351   : > { %v827_v39 = vpop.xlane.xlu0 %826 }
 0x352   : > { %1973 = vpow2.f32 %v663_v38  ;;  %v828_v40 = vsub.f32 %v824_v25, %v827_v39 }
 0x354   : > { %v829_v41 = vmul.f32 1.442695, %v828_v40  ;;  %v1705_v40 = vld [vmem:[#allocation5] ss:$0 sm:$0xff] }
 0x355   : > { %v993_v51 = vpop.xlane.xlu0 %992 }
 0x356   : > { %1975 = vpow2.f32 %v829_v41  ;;  %v994_v52 = vsub.f32 %v990_v29, %v993_v51  ;;  %v1460_v51 = vld [vmem:[%s2699_s9 + $0x28] sm:$0xff] }
 0x358   : > { %v995_v53 = vmul.f32 1.442695, %v994_v52 }
 0x359   : > { %v1159_v42 = vpop.xlane.xlu1 %1158 }
 0x35a   : > { %v1160_v43 = vsub.f32 %v1156_v33, %v1159_v42  ;;  %v1862_v33 = vpack.c.bf16 %v1363_v32, %v1362_v31  ;;  %v1706_v42 = vld [vmem:[#allocation7] ss:$0 sm:$0xff] }
 0x35c   : > { %v1974_v44 = vpop.eup %1973  ;;  %v1161_v45 = vmul.f32 1.442695, %v1160_v43 }
 0x35d   : > { %v665_v46 = vsel %vm583_vm2, %v1974_v44, 0.0  ;;  %v837_v56 = vpop.permute.xlu1 %836 }
 0x35e   : > { %1977 = vpow2.f32 %v1161_v45  ;;  %666 = vadd.xlane.f32.xlu0 %v665_v46  ;;  %v1455_v45 = vld [vmem:[%s2699_s9] sm:$0xff]  ;;  %v1456_v46 = vld [vmem:[%s2699_s9 + $0x8] sm:$0xff] }
 0x35f   : > { %1979 = vpow2.f32 %v995_v53  ;;  %v1461_v53 = vld [vmem:[%s2699_s9 + $0x30] sm:$0xff] }
 0x360   : > { %v1976_v47 = vpop.eup %1975 }
 0x361   : > { %v831_v48 = vsel %vm583_vm2, %v1976_v47, 0.0 }
 0x362   : > { %832 = vadd.xlane.f32.xlu1 %v831_v48  ;;  %v1458_v48 = vld [vmem:[%s2699_s9 + $0x18] sm:$0xff] }
 0x368   : > { %v1978_v49 = vpop.eup %1977 }
 0x369   : > { %v1163_v50 = vsel %vm583_vm2, %v1978_v49, 0.0  ;;  %v1980_v54 = vpop.eup %1979 }
 0x36a   : > { %1164 = vadd.xlane.f32.xlu1 %v1163_v50  ;;  %v997_v55 = vsel %vm583_vm2, %v1980_v54, 0.0  ;;  %v1459_v50 = vld [vmem:[%s2699_s9 + $0x20] sm:$0xff] }
 0x36b   : > { %v1874_v52 = vpack.c.bf16 %v1460_v51, %v1459_v50 }
 0x374   : > { %670 = vrot.lane.b32.xlu0 %v2509_v11, %s2196_s23  ;;  %s2733_s23 = sld [smem:[#allocation19_spill]] }
 0x37b   : > { %1002 = vrot.lane.b32.xlu1 %v2509_v11, %s2197_s18  ;;  %s2200_s18 = smov 16  }
 0x393   : > { %998 = vadd.xlane.f32.xlu0 %v997_v55 }
 0x3a9   : > { %1168 = vrot.lane.b32.xlu0 %v2509_v11, %s2198_s11  ;;  %v1261_v11 = vld [vmem:[%s2693_s3] sm:$0xff]  ;;  %s2201_s11 = smov 24  }
 0x3aa   : > { %v1856_v13 = vpack.c.bf16 %v1262_v12, %v1261_v11  ;;  %v1711_v11 = vld [vmem:[%s2733_s23] ss:$0 sm:$0xff]  ;;  %s2111_s23 = scalar_lea.vmem %s2110_s25, 256 }
 0x3ab   : > { %p2113_p7 = scmp.lt.s32.totalorder %s2111_s23, %s2105_s24 }
 0x3ac   : > { %1857 = vmatpush3.bf16.msra.mxu0 %v1856_v13  ;;  %v1712_v13 = vld [vmem:[%s2734_s14] ss:$0 sm:$0xff] }
 0x3ad   : > { %1858 = vmatprep.subr.bf16.mxu0 %v2185_v0  ;;  %p2114_p10 = por %p2113_p7, %p2112_p3 }
 0x3af   : > { %p2115_p13 = pnand %p2114_p10, %p2108_p8 }
 0x3b0   : > { %1860 = vmatpush3.bf16.msra.mxu0 %v1859_v20 }
 0x3b1   : > { %1867 = vmatprep.subr.bf16.mxu0 %v2185_v0 }
 0x3eb   : > { %v667_v57 = vpop.xlane.xlu0 %666 }
 0x3ec   : > { %1981 = vrcp.f32 %v667_v57 }
 0x3ef   : > { %v671_v58 = vpop.permute.xlu0 %670  ;;  %v833_v59 = vpop.xlane.xlu1 %832 }
 0x3f0   : > { %1983 = vrcp.f32 %v833_v59  ;;  %1774 = vmatpush3.msra.mxu1 %v671_v58 }
 0x3f1   : > { %1783 = vmatprep.subr.mxu1 %v2187_v1 }
 0x3f6   : > { %v1982_v60 = vpop.eup %1981 }
 0x3f7   : > { %v669_v61 = vmul.f32 %v1982_v60, %v1974_v44  ;;  %v1165_v62 = vpop.xlane.xlu1 %1164 }
 0x3f9   : > { %1776 = vmatmul.mubr.msk.f32.vlgmr.msra.gmra.mrb[4].mxu1 %vm583_vm2, %v669_v61 }
 0x3fa   : > { %v1984_v63 = vpop.eup %1983  ;;  %1784 = vmatpush3.msra.mxu1 %v837_v56  ;;  %1785 = vmatprep.mubr.msk.f32.mxu1 %vm2186_vm0, %v2187_v1  ;;  %v1707_v56 = vld [vmem:[#allocation8] ss:$0 sm:$0xff] }
 0x3fb   : > { %v835_v2 = vmul.f32 %v1984_v63, %v1976_v47  ;;  %v1003_v3 = vpop.permute.xlu1 %1002  ;;  %1793 = vmatprep.subr.mxu1 %v2187_v1  ;;  %v1868_v47 = vpack.c.bf16 %v1456_v46, %v1455_v45 }
 0x3fd   : > { %1786 = vmatmul.mubr.msk.f32.vlgmr.msra.gmra.mrb[6].mxu1 %vm583_vm2, %v835_v2 }
 0x3fe   : > { %1794 = vmatpush3.msra.mxu1 %v1003_v3  ;;  %1795 = vmatprep.mubr.msk.f32.mxu1 %vm2186_vm0, %v2187_v1 }
 0x3ff   : > { %1803 = vmatprep.subr.mxu1 %v2187_v1 }
 0x420   : > { %v999_v4 = vpop.xlane.xlu0 %998 }
 0x421   : > { %1985 = vrcp.f32 %v999_v4 }
 0x422   : > { %1987 = vrcp.f32 %v1165_v62 }
 0x424   : > { %v1169_v9 = vpop.permute.xlu0 %1168 }
 0x42b   : > { %v1986_v5 = vpop.eup %1985 }
 0x42c   : > { %v1001_v6 = vmul.f32 %v1986_v5, %v1980_v54  ;;  %v1988_v7 = vpop.eup %1987  ;;  %v1462_v54 = vld [vmem:[%s2699_s9 + $0x38] sm:$0xff] }
 0x42d   : > { %v1167_v10 = vmul.f32 %v1988_v7, %v1978_v49  ;;  %v1877_v55 = vpack.c.bf16 %v1462_v54, %v1461_v53 }
 0x42e   : > { %1796 = vmatmul.mubr.msk.f32.vlgmr.msra.gmra.mrb[8].mxu1 %vm583_vm2, %v1001_v6  ;;  %v1709_v6 = vld [vmem:[%s2700_s10] ss:$0 sm:$0xff] }
 0x42f   : > { %1804 = vmatpush3.msra.mxu1 %v1169_v9  ;;  %1805 = vmatprep.mubr.msk.f32.mxu1 %vm2186_vm0, %v2187_v1 }
 0x430   : > { %1861 = vmatprep.subr.bf16.mxu1 %v2185_v0 }
 0x432   : > { %1806 = vmatmul.mubr.msk.f32.vlgmr.msra.gmra.mrb[10].mxu1 %vm583_vm2, %v1167_v10 }
 0x433   : > { %1827 = vmatprep.mubr.msk.f32.mxu1 %vm2186_vm0, %v2187_v1  ;;  %1863 = vmatpush3.bf16.msra.mxu1 %v1862_v33 }
 0x434   : > { %1864 = vmatprep.subr.bf16.mxu1 %v2185_v0 }
 0x4cc   : > { %v742_v14 = vpop.f32.mrb[4].mxu1 }
 0x4cd   : > { %v1777_v15 = vpop.f32.mrb[5].mxu1 }
 0x4d0   : > { %v908_v16 = vpop.f32.mrb[6].mxu1 }
 0x4d1   : > { %1245 = vrot.lane.b32.xlu1 %v908_v16, %s2199_s12  ;;  %v1787_v17 = vpop.f32.mrb[7].mxu1 }
 0x501   : > { %v1074_v21 = vpop.f32.mrb[8].mxu1 }
 0x502   : > { %1249 = vrot.lane.b32.xlu0 %v1074_v21, %s2200_s18  ;;  %v1797_v22 = vpop.f32.mrb[9].mxu1 }
 0x505   : > { %v1240_v23 = vpop.f32.mrb[10].mxu1 }
 0x506   : > { %1253 = vrot.lane.b32.xlu1 %v1240_v23, %s2201_s11  ;;  %v1807_v24 = vpop.f32.mrb[11].mxu1 }
 0x543   : > { %v1246_v25 = vpop.permute.xlu1 %1245 }
 0x544   : > { %v1256_v27 = vsel %vm583_vm2, %v742_v14, %v1246_v25 }
 0x574   : > { %v1250_v26 = vpop.permute.xlu0 %1249 }
 0x575   : > { %v1258_v28 = vsel %vm1257_vm3, %v1256_v27, %v1250_v26 }
 0x578   : > { %v1254_v29 = vpop.permute.xlu1 %1253 }
 0x579   : > { %v1260_v30 = vsel %vm1259_vm4, %v1258_v28, %v1254_v29 }
 0x57a   : > { %1817 = vmatmul.mubr.msk.f32.vlgmr.msra.gmra.mrb[6].mxu0 %vm506_vm1, %v1260_v30 }
 0x57b   : > { %1846 = vmatprep.mubr.msk.f32.mxu0 %vm2186_vm0, %v2187_v1  ;;  %v1365_v1 = vld [vmem:[%s2697_s7 + $0x18] sm:$0xff]  ;;  %1869 = vmatpush3.bf16.msra.mxu0 %v1868_v47 }
 0x57c   : > { %v1865_v35 = vpack.c.bf16 %v1365_v1, %v1364_v34  ;;  %1870 = vmatprep.subr.bf16.mxu0 %v2185_v0 }
 0x57e   : > { %1866 = vmatpush3.bf16.msra.mxu1 %v1865_v35 }
 0x64d   : > { %v1341_v37 = vpop.f32.mrb[6].mxu0 }
 0x64e   : > { %v1342_v38 = vadd.f32 %v1703_v36, %v1341_v37  ;;  %v1818_v39 = vpop.f32.mrb[7].mxu0 }
 0x650   : > { %v1345_v41 = vadd.f32 %v1342_v38, %v2499_v8  ;;  %v1457_v8 = vld [vmem:[%s2699_s9 + $0x10] sm:$0xff] }
 0x651   : > { %v1871_v49 = vpack.c.bf16 %v1458_v48, %v1457_v8 }
 0x652   : > { %v1353_v43 = vmul.f32 %v1705_v40, %v1345_v41 }
 0x653   : > { %1872 = vmatpush3.bf16.msra.mxu0 %v1871_v49 }
 0x654   : > { %v1361_v44 = vadd.f32 %v1706_v42, %v1353_v43  ;;  %1873 = vmatprep.subr.bf16.mxu0 %v2185_v0 }
 0x656   : > { %1828 = vmatmul.mubr.msk.f32.vlgmr.msra.gmra.mrb[12].mxu1 %vm506_vm1, %v1361_v44 }
 0x657   : > { %1875 = vmatpush3.bf16.msra.mxu0 %v1874_v52 }
 0x658   : > { %1876 = vmatprep.subr.bf16.mxu0 %v2185_v0 }
 0x65b   : > { %1878 = vmatpush3.bf16.msra.mxu0 %v1877_v55 }
 0x729   : > { %v1442_v57 = vpop.f32.mrb[12].mxu1 }
 0x72a   : > { %v1443_v58 = vadd.f32 %v1707_v56, %v1442_v57  ;;  %v1829_v59 = vpop.f32.mrb[13].mxu1 }
 0x72c   : > { %v1446_v60 = vmul.f32 %v1443_v58, %v1443_v58 }
 0x72e   : > { %v1447_v61 = vmul.f32 %v1446_v60, %v1443_v58 }
 0x730   : > { %v1448_v62 = vmul.f32 0.044715, %v1447_v61 }
 0x732   : > { %v1449_v63 = vadd.f32 %v1448_v62, %v1443_v58 }
 0x734   : > { %v1450_v0 = vmul.f32 0.7978846, %v1449_v63 }
 0x736   : > { %1989 = vtanh.f32 %v1450_v0 }
 0x740   : > { %v1990_v2 = vpop.eup %1989 }
 0x741   : > { %v1452_v3 = vadd.f32 1.0, %v1990_v2 }
 0x743   : > { %v1453_v4 = vmul.f32 0.5, %v1452_v3 }
 0x745   : > { %v1454_v5 = vmul.f32 %v1453_v4, %v1443_v58 }
 0x747   : > { %1847 = vmatmul.mubr.msk.f32.vlgmr.msra.gmra.mrb[8].mxu0 %vm1470_vm5, %v1454_v5 }
 0x81a   : > { %v1540_v7 = vpop.f32.mrb[8].mxu0 }
 0x81b   : > { %v1541_v9 = vadd.f32 %v1709_v6, %v1540_v7  ;;  %v1848_v10 = vpop.f32.mrb[9].mxu0 }
 0x81d   : > { %v1544_v12 = vadd.f32 %v1541_v9, %v1361_v44 }
 0x81f   : > { %v1552_v14 = vmul.f32 %v1711_v11, %v1544_v12 }
 0x821   : > { %v1560_v15 = vadd.f32 %v1712_v13, %v1552_v14 }
 0x823   : > { %1561 = vst.msk [vmem:[%s493_s16] sm:$0xff] %vm506_vm1, %v1560_v15 }
 0x824   : > { %2118 = shalt.err (!%p2115_p13)
}
 0x825   : > { %s2119_s30 = scalar_lea.hbm %s2645_s1, 128  ;;  %s2123_s14 = scalar_lea.hbm %s2735_s0, 256 }
 0x826   : > { %p2120_p5 = scmp.ne.s32.totalorder %s2645_s1, %s2119_s30  ;;  %p2124_p9 = scmp.lt.u32.totalorder %s2645_s1, %s2735_s0 }
 0x827   : > { %p2125_p12 = scmp.lt.u32.totalorder %s2123_s14, %s2119_s30  ;;  %p2127_p1 = scmp.lt.u32.totalorder %s2119_s30, %s2645_s1 }
 0x828   : > { %p2121_p0 = pnand %p2120_p5, %p2417_p6 }
 0x829   : > { %p2126_p2 = por %p2125_p12, %p2124_p9 }
 0x82a   : > { %p2122_p11 = pneg %p2121_p0 }
 0x82b   : > { %p2128_p4 = por %p2127_p1, %p2126_p2 }
 0x82d   : > { %p2129_p8 = pnand %p2128_p4, %p2122_p11 }
 0x82f   : > { %2132 = shalt.err (!%p2129_p8)
}
 0x830   : > { %1893 = dma.vmem_to_hbm [thread:$0]  (%p2417_p6), %s2647_s20, 128, %s2645_s1, %s1563_s21  }
 0x831 PF: > { %s2736_s12 = sld [smem:[#allocation15_spill]]  ;;  %s2737_s15 = sld [smem:[#allocation16_spill]] }
 0x832   : > { %p2739_p7 = scmp.ge.s32.totalorder %s2179_s28, 2 }
 0x837   : > { %s1588_s24 = sand.u32 1, %s2736_s12   ;;  %p2738_p3 = scmp.ne.s32.totalorder %s2737_s15, 0 }
 0x838   : > { %s1589_s29 = scalar_lea.sflag [#allocation4], %s1588_s24 }
 0x839   : > { %p1910_p10 = pnand %p2739_p7, %p2738_p3 }
 0x83b   : > { %2162 = dma.done.wait (!%p1910_p10), %s1589_s29, 128  }
 0x83c   : > { %2164 = vsyncadd (!%p1910_p10), %s1589_s29, 4294967168  ;;  %p28_p13 = scmp.ge.s32.totalorder %s2403_s19, 4   ;;  %s2740_s25 = smov %s2171_s26 }
 0x83d   : > { %s2741_s26 = smov %s2175_s27  ;;  %s2742_s27 = smov %s2413_s13 }
 0x83e   : > { %s2743_s28 = smov %s2403_s19  ;;  %30 = sbr.rel (!%p28_p13) target bundleno = 13 (0xd), region = 129 }
 0x845   :  { %1594 = vsyncpa [#allocation3], 1 }
 0x846   :  { %1596 = vsyncpa [#allocation3 + $0x1], 1 }
 0x847   :  { %1597 = vsyncpa [#allocation6], 1 }
 0x848   :  { %1598 = vsyncpa [#allocation9], 1 }
 0x849   :  { %1599 = vsyncpa [#allocation4], 1 }
 0x84a   :  { %1601 = vsyncpa [#allocation4 + $0x1], 1 }

</bundles_post_ra>
